<compile_context>
chip_gen: v7x
topology: tpu7x:2x2x1
jax: 0.10.0
libtpu: 0.0.40
codegen_flags: <defaults>
</compile_context>

<pallas_src>
import jax
import jax.numpy as jnp
from jax import lax
from jax.experimental import pallas as pl
from jax.experimental.pallas import tpu as pltpu


def _round_up(x, m):
    return (x + m - 1) // m * m


def _matmul_bias_relu_kernel(w_ref, x_ref, b_ref, o_ref):
    """Fused (C_pad8, K) @ (K, block_m) + bias + ReLU.

    w_ref: (C_pad8, K)       bf16 flattened conv weight (zero rows in padding)
    x_ref: (K, block_m)      bf16 im2col patch columns
    b_ref: (C_pad8, 1)       f32 bias (zero in padded channels)
    o_ref: (C_pad8, block_m) f32 output (channels on sublanes, pixels on lanes)
    """
    acc = jnp.dot(w_ref[...], x_ref[...], preferred_element_type=jnp.float32)
    acc = acc + b_ref[...]                     # (C_pad8, block_m) + (C_pad8, 1)
    o_ref[...] = jnp.maximum(acc, 0.0).astype(o_ref.dtype)


def conv2d_relu(x_nchw, weight_oihw, bias, *, stride=1, padding=1, dilation=1,
                block_m=1024, compute_dtype=jnp.bfloat16):
    """PyTorch-equivalent nn.Conv2d(stride, padding, dilation) + nn.ReLU()."""
    N, C_in, H, W = x_nchw.shape
    C_out, C_in_w, KH, KW = weight_oihw.shape
    assert C_in_w == C_in, "weight / input channel mismatch"

    Ho = (H + 2 * padding - dilation * (KH - 1) - 1) // stride + 1
    Wo = (W + 2 * padding - dilation * (KW - 1) - 1) // stride + 1
    K = KH * KW * C_in
    M = N * Ho * Wo

    # ---- wrapper-side glue: cast early, CNHW, pad, im2col (transposed) ------
    x_bf = x_nchw.astype(compute_dtype)                       # bf16 BEFORE passes
    x_cnhw = jnp.transpose(x_bf, (1, 0, 2, 3))                # (C, N, H, W)
    xp = jnp.pad(x_cnhw, ((0, 0), (0, 0),
                          (padding, padding), (padding, padding)))

    taps = []
    for kh in range(KH):
        for kw in range(KW):
            h0, w0 = kh * dilation, kw * dilation
            taps.append(xp[:, :, h0:h0 + (Ho - 1) * stride + 1:stride,
                               w0:w0 + (Wo - 1) * stride + 1:stride])
    # (KH*KW, C, N, Ho, Wo) -> (K, M); K index = (kh*KW + kw)*C_in + c
    patches_t = jnp.stack(taps, axis=0).reshape(K, M)

    # weight (O,I,KH,KW) -> (O,KH,KW,I) -> (C_out, K), matching patch K order.
    w = jnp.transpose(weight_oihw, (0, 2, 3, 1)).reshape(C_out, K)

    # ---- tiling: lane-dense M, tiny sublane C; keep grid >= 2 for v7x -------
    LANE = 128
    SUB = 8
    C_pad8 = _round_up(C_out, SUB)

    M_aligned = _round_up(M, LANE)
    half = max(LANE, (M_aligned // 2) // LANE * LANE)   # grid stays >= 2 when M >= 256
    block_m = max(LANE, min(block_m, half) // LANE * LANE)
    M_pad = _round_up(M, block_m)

    patches_t = jnp.pad(patches_t, ((0, 0), (0, M_pad - M)))          # bf16, K=36 kept
    w = jnp.pad(w, ((0, C_pad8 - C_out), (0, 0))).astype(compute_dtype)
    b = jnp.pad(bias.astype(jnp.float32), (0, C_pad8 - C_out)).reshape(C_pad8, 1)

    grid = (M_pad // block_m,)
    out = pl.pallas_call(
        _matmul_bias_relu_kernel,
        out_shape=jax.ShapeDtypeStruct((C_pad8, M_pad), jnp.float32),
        grid=grid,
        in_specs=[
            pl.BlockSpec((C_pad8, K), lambda i: (0, 0)),      # weight, resident
            pl.BlockSpec((K, block_m), lambda i: (0, i)),     # patch columns
            pl.BlockSpec((C_pad8, 1), lambda i: (0, 0)),      # bias, resident
        ],
        out_specs=pl.BlockSpec((C_pad8, block_m), lambda i: (0, i)),
        compiler_params=pltpu.CompilerParams(
            dimension_semantics=("parallel",),
            vmem_limit_bytes=32 * 1024 * 1024),
    )(w, patches_t, b)

    # (C_out, N*Ho*Wo) -> (C_out, N, Ho, Wo) -> (N, C_out, Ho, Wo)
    out = out[:C_out, :M].reshape(C_out, N, Ho, Wo)
    return jnp.transpose(out, (1, 0, 2, 3)).astype(x_nchw.dtype)


def _reference(x_nchw, weight_oihw, bias, *, stride=1, padding=1, dilation=1):
    y = lax.conv_general_dilated(
        x_nchw, weight_oihw, window_strides=(stride, stride),
        padding=((padding, padding), (padding, padding)),
        rhs_dilation=(dilation, dilation),
        dimension_numbers=("NCHW", "OIHW", "NCHW"))
    y = y + bias.reshape(1, -1, 1, 1)
    return jnp.maximum(y, 0.0)


if __name__ == "__main__":
    # Module config: Conv2d(in_ch=4, out_ch=8, kernel_size=3, stride=1,
    #                        padding=1, D=1, activation=ReLU)
    N, C_in, H, W = 2, 4, 16, 16
    C_out, KH, KW = 8, 3, 3

    key = jax.random.PRNGKey(0)
    kx, kw, kb = jax.random.split(key, 3)

    x = jax.random.normal(kx, (N, C_in, H, W), dtype=jnp.float32)
    fan_in = C_in * KH * KW
    bound = 1.0 / (fan_in ** 0.5)
    weight = jax.random.uniform(kw, (C_out, C_in, KH, KW),
                                minval=-bound, maxval=bound, dtype=jnp.float32)
    bias = jax.random.uniform(kb, (C_out,),
                              minval=-bound, maxval=bound, dtype=jnp.float32)

    out = conv2d_relu(x, weight, bias, stride=1, padding=1, dilation=1)
    out = jax.block_until_ready(out)
    assert out.shape == (N, C_out, H, W)

    # Tight check: same bf16-quantized operands as the kernel, f32 accumulation.
    x_q = x.astype(jnp.bfloat16).astype(jnp.float32)
    w_q = weight.astype(jnp.bfloat16).astype(jnp.float32)
    ref_q = _reference(x_q, w_q, bias)
    assert jnp.allclose(out, ref_q, atol=1e-4, rtol=1e-4), "bf16-path mismatch"

    # Loose check vs. full-f32 reference (bf16 input quantization noise only).
    ref = _reference(x, weight, bias)
    assert jnp.allclose(out, ref, atol=2e-2, rtol=2e-2), "f32 reference mismatch"

    print("KERNEL_OK")
</pallas_src>

<mosaic_0001>
module attributes {stable_mosaic.version = 11 : i64} {
  func.func @_matmul_bias_relu_kernel(%arg0: i32, %arg1: memref<8x36xbf16, #tpu.memory_space<vmem>>, %arg2: memref<36x256xbf16, #tpu.memory_space<vmem>>, %arg3: memref<8x1xf32, #tpu.memory_space<vmem>>, %arg4: memref<8x256xf32, #tpu.memory_space<vmem>>) attributes {dimension_semantics = [#tpu.dimension_semantics<parallel>], iteration_bounds = array<i64: 2>, scalar_prefetch = 0 : i64, scratch_operands = 0 : i64, tpu.core_type = #tpu.core_type<tc>, window_params = [{pipeline_mode = #tpu.pipeline_mode<synchronous>, transform_indices = @transform_0, window_bounds = array<i64: 8, 36>}, {transform_indices = @transform_1, window_bounds = array<i64: 36, 256>}, {pipeline_mode = #tpu.pipeline_mode<synchronous>, transform_indices = @transform_2, window_bounds = array<i64: 8, 1>}, {transform_indices = @transform_3, window_bounds = array<i64: 8, 256>}]} {
    %c0 = arith.constant 0 : index
    %c0_0 = arith.constant 0 : index
    %0 = vector.load %arg1[%c0, %c0_0] : memref<8x36xbf16, #tpu.memory_space<vmem>>, vector<8x36xbf16>
    %c0_1 = arith.constant 0 : index
    %c0_2 = arith.constant 0 : index
    %1 = vector.load %arg2[%c0_1, %c0_2] : memref<36x256xbf16, #tpu.memory_space<vmem>>, vector<36x256xbf16>
    %cst = arith.constant dense<0.000000e+00> : vector<8x256xf32>
    %2 = tpu.matmul %0, %1, %cst {dimension_numbers = #tpu.dot_dimension_numbers<[1], [0], [0], [1], [0, 0, 1, 1], [], []>} : vector<8x36xbf16>, vector<36x256xbf16>, vector<8x256xf32> -> vector<8x256xf32>
    %c0_3 = arith.constant 0 : index
    %c0_4 = arith.constant 0 : index
    %3 = vector.load %arg3[%c0_3, %c0_4] : memref<8x1xf32, #tpu.memory_space<vmem>>, vector<8x1xf32>
    %4 = vector.broadcast %3 : vector<8x1xf32> to vector<8x256xf32>
    %5 = arith.addf %2, %4 : vector<8x256xf32>
    %cst_5 = arith.constant 0.000000e+00 : f32
    %6 = vector.broadcast %cst_5 : f32 to vector<8x256xf32>
    %7 = arith.maximumf %5, %6 : vector<8x256xf32>
    %c0_6 = arith.constant 0 : index
    %c0_7 = arith.constant 0 : index
    %8 = vector.load %arg4[%c0_6, %c0_7] : memref<8x256xf32, #tpu.memory_space<vmem>>, vector<8x256xf32>
    tpu.vector_store %arg4[%c0_6, %c0_7], %7 {strides = array<i32>} : memref<8x256xf32, #tpu.memory_space<vmem>>, vector<8x256xf32>,
    return
  }
  func.func @transform_0(%arg0: i32) -> (i32, i32) {
    %c0_i32 = arith.constant 0 : i32
    %c0_i32_0 = arith.constant 0 : i32
    %c0_i32_1 = arith.constant 0 : i32
    return %c0_i32, %c0_i32_0 : i32, i32
  }
  func.func @transform_1(%arg0: i32) -> (i32, i32) {
    %c0_i32 = arith.constant 0 : i32
    %c0_i32_0 = arith.constant 0 : i32
    return %c0_i32, %arg0 : i32, i32
  }
  func.func @transform_2(%arg0: i32) -> (i32, i32) {
    %c0_i32 = arith.constant 0 : i32
    %c0_i32_0 = arith.constant 0 : i32
    %c0_i32_1 = arith.constant 0 : i32
    return %c0_i32, %c0_i32_0 : i32, i32
  }
  func.func @transform_3(%arg0: i32) -> (i32, i32) {
    %c0_i32 = arith.constant 0 : i32
    %c0_i32_0 = arith.constant 0 : i32
    return %c0_i32, %arg0 : i32, i32
  }
}

</mosaic_0001>

<bundles_post_ra>
// kernel: tpu_custom_call.1
= control target key start
LH: loop header
LB: loop body
LE: loop exit
PB: predicated region body
PF: predicated region fallthrough
CT: control target
= control target key end

     0   :  { %8 = vsyncpa [#allocation3], 0  ;;  %s740_s0 = inlined_call_operand.vmem [shape: bf16[8,36], index: 0, kind: input, shape index: {}]   ;;  %s741_s1 = inlined_call_operand.hbm [shape: bf16[36,512], index: 1, kind: input, shape index: {}]   ;;  %s742_s2 = inlined_call_operand.vmem [shape: f32[8,1], index: 2, kind: input, shape index: {}]   ;;  %s743_s3 = inlined_call_operand.hbm [shape: f32[8,512], index: 3, kind: output, shape index: {}]  }
   0x1   :  { %10 = vsyncpa [#allocation3 + $0x1], 0 }
   0x2   :  { %11 = vsyncpa [#allocation4], 0 }
   0x3   :  { %13 = vsyncpa [#allocation4 + $0x1], 0  ;;  %s577_s12 = smov 0   ;;  %s579_s13 = smov 0  }
   0x4   :  { %s581_s14 = smov 0   ;;  %s583_s15 = smov 0  }
   0x5 LB: > { %s598_s16 = sadd.s32 4294967295, %s549_s15   ;;  %s370_s17 = sadd.s32 4294967294, %s549_s15   ;;  %s549_s15 = sphi %s583_s15, %s756_s15   ;;  %s545_s14 = sphi %s581_s14, %s755_s14   ;;  %s541_s13 = sphi %s579_s13, %s754_s13   ;;  %s537_s12 = sphi %s577_s12, %s753_s12  }
   0x6   : > { %s602_s18 = sadd.s32 1, %s549_s15   ;;  %s47_s19 = sadd.s32 1, %s545_s14 }
   0x7   : > { %s44_s20 = ssub.s32 %s549_s15, %s602_s18  ;;  %p54_p0 = scmp.ne.s32.totalorder %s545_s14, %s541_s13 }
   0x8   : > { %p45_p1 = scmp.eq.s32.totalorder %s44_s20, 0  ;;  %p55_p2 = scmp.eq.s32.totalorder %s549_s15, 0 }
   0x9   : > { %p60_p3 = scmp.ne.s32.totalorder %s541_s13, %s537_s12  ;;  %p61_p4 = scmp.eq.s32.totalorder %s598_s16, 0 }
   0xa   : > { %s614_s21 = scalar_select %p45_p1, %s545_s14, %s47_s19  }
   0xb   : > { %p56_p5 = por %p55_p2, %p54_p0  ;;  %p616_p6 = por %p61_p4, %p60_p3 }
   0xc   : > { %p105_p7 = scmp.eq.s32.totalorder %s598_s16, 1  ;;  %p111_p8 = scmp.eq.s32.totalorder %s370_s17, 1 }
   0xd   : > { %p406_p10 = scmp.lt.s32.totalorder %s549_s15, 2  ;;  %s137_s25 = sand.u32 1, %s545_s14  }
   0xe   : > { %p623_p11 = por %p105_p7, %p54_p0  ;;  %p627_p12 = por %p111_p8, %p60_p3 }
   0xf   : > { %s390_s26 = sshll.u32 %s549_s15, 7  ;;  %s392_s27 = smul.u32 40, %s137_s25 }
  0x10   : > { %s746_s23 = scalar_select %p623_p11, 1, 0 }
  0x11   : > { %s747_s24 = scalar_select %p627_p12, 1, 0 }
  0x12   : > { %s636_s30 = scalar_lea.hbm %s741_s1, %s390_s26  ;;  %p638_p13 = pnand %p406_p10, %p56_p5 }
  0x13   : > { %s141_s5 = scalar_lea.vmem [#allocation2], %s392_s27  ;;  %s645_s7 = scalar_lea.sflag [#allocation3], %s137_s25 }
  0x14   : > { %s148_s6 = sshll.u32 %s141_s5, 4  ;;  %s453_s8 = scalar_lea.hbm %s636_s30, 640  ;;  %s642_s6 = int_to_ptr.vmem [resolvable:$true] %s148_s6 }
  0x15   : > { %p454_p1 = scmp.ne.s32.totalorder %s636_s30, %s453_s8  ;;  %p455_p2 = pneg %p638_p13 }
  0x16   : > { %s458_s11 = scalar_lea.hbm %s741_s1, 1280  ;;  %p459_p5 = scmp.lt.u32.totalorder %s636_s30, %s741_s1 }
  0x17   : > { %p456_p3 = pnand %p455_p2, %p454_p1  ;;  %p460_p7 = scmp.lt.u32.totalorder %s458_s11, %s453_s8 }
  0x18   : > { %p462_p10 = scmp.lt.u32.totalorder %s453_s8, %s636_s30 }
  0x19   : > { %p457_p4 = pneg %p456_p3  ;;  %p461_p8 = por %p460_p7, %p459_p5 }
  0x1b   : > { %p463_p9 = por %p462_p10, %p461_p8 }
  0x1d   : > { %p464_p0 = pnand %p463_p9, %p457_p4 }
  0x1f   : > { %467 = shalt.err (!%p464_p0)
}
  0x20   : > { %s468_s20 = scalar_lea.vmem %s642_s6, 640  ;;  %s551_s25 = smov [#allocation2]  }
  0x21   : > { %p469_p1 = scmp.ne.s32.totalorder %s642_s6, %s468_s20  ;;  %s473_s26 = sshll.u32 %s551_s25, 4  ;;  %s474_s26 = int_to_ptr.vmem [resolvable:$false] %s473_s26 }
  0x22   : > { %s475_s27 = scalar_lea.vmem %s474_s26, 1280  ;;  %p476_p11 = scmp.lt.s32.totalorder %s642_s6, %s474_s26 }
  0x23   : > { %p471_p3 = pnand %p469_p1, %p455_p2  ;;  %p477_p5 = scmp.lt.s32.totalorder %s475_s27, %s468_s20 }
  0x25   : > { %p472_p12 = pneg %p471_p3  ;;  %p478_p7 = por %p477_p5, %p476_p11 }
  0x27   : > { %p479_p8 = pnand %p478_p7, %p472_p12 }
  0x29   : > { %482 = shalt.err (!%p479_p8)
}
  0x2a   : > { %s552_s28 = smov 256   ;;  %s553_s29 = smov 128  }
  0x2b   : > { %s554_s5 = smov 8   ;;  %p156_p9 = scmp.lt.s32.totalorder %s549_s15, 3 }
  0x2c   : > { %401 = dma.hbm_to_vmem [thread:$0]  (!%p638_p13), %s636_s30, 640, %s642_s6, %s645_s7, %s552_s28, %s553_s29, %s554_s5  }
  0x2d   : > { %p749_p0 = scmp.ge.s32.totalorder %s549_s15, 1 }
  0x2f   : > { %p157_p2 = pnand %p749_p0, %p156_p9 }
  0x30   : > { %s677_s8 = sand.u32 (!%p157_p2), 1, %s541_s13  }
  0x31   : > { %160 = sbr.rel (%p157_p2) target bundleno = 302 (0x12e), region = 32  ;;  %s163_s10 = scalar_lea.sflag (!%p157_p2), [#allocation3], %s677_s8 }
  0x32   : > { %s393_s9 = smul.u32 (!%p157_p2), 40, %s677_s8 }
  0x34   : > { %s166_s11 = scalar_lea.vmem (!%p157_p2), [#allocation2], %s393_s9 }
  0x38   : > { %528 = dma.done.wait (%p616_p6), %s163_s10, 640  }
  0x39   : > { %530 = vsyncadd (%p616_p6), %s163_s10, 4294966656  ;;  %v555_v0 = vmov 0   ;;  %v445_v1 = vld [vmem:[%s166_s11 + $0x4] ss:$8 sps:$4 sm:$0xff]   ;;  %v447_v2 = vld [vmem:[%s166_s11] ss:$8 sps:$4 sm:$0xff]  }
  0x3a   : > { %272 = vmatprep.mubr.bf16.mxu0 %v555_v0  ;;  %444 = vset.pattern.permute.xlu0 %v555_v0  ;;  %v448_v3 = vld [vmem:[%s166_s11 + $0x14] ss:$8 sps:$4 sm:$0xff]   ;;  %v197_v4 = vld [vmem:[%s166_s11 + $0x20] sm:$0x33]  ;;  %v450_v5 = vld [vmem:[%s166_s11 + $0x10] ss:$8 sps:$4 sm:$0xff]  }
  0x3b   : > { %240 = vmatprep.subr.bf16.mxu0 %v445_v1  ;;  %v198_v6 = vld [vmem:[%s742_s2] sm:$0xff]  ;;  %v382_v7 = vcombine.high %v197_v4, %v197_v4  ;;  %v381_v8 = vcombine.low %v197_v4, %v197_v4  ;;  %vm233_vm0 = vcmask 1041408   ;;  %vm229_vm1 = vcmask 293888   ;;  %s376_s7 = sshll.u32 %s677_s8, 4  ;;  %s391_s17 = sshll.u32 %s598_s16, 8 }
  0x3c   : > { %241 = vmatpush1.bf16.msra.mxu0 %v447_v2  ;;  %201 = vperm.xlu0 %444, %v198_v6   ;;  %v192_v10 = vld [vmem:[%s740_s0] sm:$0xf]  ;;  %s188_s19 = scalar_lea.vmem [#allocation5], %s376_s7  ;;  %s696_s27 = scalar_lea.hbm %s743_s3, %s391_s17 }
  0x3d   : > { %242 = vmatprep.subr.bf16.mxu0 %v448_v3  ;;  %v235_v9 = vsel %vm233_vm0, %v381_v8, 0  ;;  %s300_s20 = sshll.u32 %s188_s19, 4  ;;  %s286_s16 = scalar_lea.sflag [#allocation4], %s677_s8  ;;  %s698_s20 = int_to_ptr.vmem [resolvable:$true] %s300_s20 }
  0x3e   : > { %s483_s28 = scalar_lea.vmem %s698_s20, 256  ;;  %p750_p11 = scmp.ne.s32.totalorder %s746_s23, 0 }
  0x3f   : > { %p484_p6 = scmp.ne.s32.totalorder %s698_s20, %s483_s28  ;;  %s556_s29 = smov [#allocation5]  }
  0x40   : > { %243 = vmatpush1.bf16.msra.mxu0 %v450_v5  ;;  %s487_s5 = sshll.u32 %s556_s29, 4  ;;  %s488_s5 = int_to_ptr.vmem [resolvable:$false] %s487_s5 }
  0x41   : > { %383 = vmatprep.subr.msk.bf16.mxu0 %vm233_vm0, %v382_v7  ;;  %p485_p12 = pnand %p484_p6, %p750_p11  ;;  %s489_s9 = scalar_lea.vmem %s488_s5, 512 }
  0x42   : > { %p490_p4 = scmp.lt.s32.totalorder %s698_s20, %s488_s5  ;;  %p491_p10 = scmp.lt.s32.totalorder %s489_s9, %s483_s28 }
  0x43   : > { %p486_p13 = pneg %p485_p12 }
  0x44   : > { %245 = vmatpush1.bf16.msra.mxu0 %v235_v9  ;;  %p492_p1 = por %p491_p10, %p490_p4 }
  0x46   : > { %p493_p3 = pnand %p492_p1, %p486_p13 }
  0x47   : > { %384 = vmatmul.mubr.msk.bf16.vlgmr.msra.gmra.mrb[0].mxu0 %vm229_vm1, %v192_v10 }
  0xbb   : > { %v202_v11 = vpop.permute.xlu0 %201 }
 0x11a   : > { %v274_v12 = vpop.f32.mrb[0].mxu0 }
 0x11b   : > { %v275_v13 = vadd.f32 %v274_v12, %v202_v11  ;;  %v276_v14 = vpop.f32.mrb[1].mxu0 }
 0x11c   : > { %v277_v15 = vadd.f32 %v276_v14, %v202_v11  ;;  %v278_v16 = vpop.f32.mrb[2].mxu0 }
 0x11d   : > { %v281_v17 = vmax.f32 %v275_v13, 0.0  ;;  %v279_v18 = vpop.f32.mrb[3].mxu0 }
 0x11e   : > { %v282_v19 = vmax.f32 %v277_v15, 0.0 }
 0x11f   : > { %283 = vst [vmem:[%s188_s19] sm:$0xff] %v281_v17 }
 0x120   : > { %284 = vst [vmem:[%s188_s19 + $0x8] sm:$0xff] %v282_v19 }
 0x121   : > { %496 = shalt.err (!%p493_p3)
}
 0x122   : > { %s497_s8 = scalar_lea.hbm %s696_s27, 256  ;;  %s501_s30 = scalar_lea.hbm %s743_s3, 512 }
 0x123   : > { %p498_p5 = scmp.ne.s32.totalorder %s696_s27, %s497_s8  ;;  %p502_p9 = scmp.lt.u32.totalorder %s696_s27, %s743_s3 }
 0x124   : > { %p503_p0 = scmp.lt.u32.totalorder %s501_s30, %s497_s8  ;;  %p505_p6 = scmp.lt.u32.totalorder %s497_s8, %s696_s27 }
 0x125   : > { %p499_p7 = pnand %p498_p5, %p750_p11 }
 0x126   : > { %p504_p2 = por %p503_p0, %p502_p9 }
 0x127   : > { %p500_p8 = pneg %p499_p7 }
 0x128   : > { %p506_p12 = por %p505_p6, %p504_p2 }
 0x12a   : > { %p507_p13 = pnand %p506_p12, %p500_p8 }
 0x12c   : > { %510 = shalt.err (!%p507_p13)
}
 0x12d   : > { %396 = dma.vmem_to_hbm [thread:$0]  (%p750_p11), %s698_s20, 256, %s696_s27, %s286_s16  }
 0x12e PF: > { %s312_s6 = sand.u32 1, %s537_s12   ;;  %p751_p4 = scmp.ne.s32.totalorder %s747_s24, 0 }
 0x12f   : > { %p752_p10 = scmp.ge.s32.totalorder %s549_s15, 2  ;;  %s313_s7 = scalar_lea.sflag [#allocation4], %s312_s6 }
 0x131   : > { %p403_p1 = pnand %p752_p10, %p751_p4 }
 0x133   : > { %532 = dma.done.wait (!%p403_p1), %s313_s7, 256  }
 0x134   : > { %534 = vsyncadd (!%p403_p1), %s313_s7, 4294967040  ;;  %p16_p3 = scmp.ge.s32.totalorder %s602_s18, 4   ;;  %s753_s12 = smov %s541_s13 }
 0x135   : > { %s754_s13 = smov %s545_s14  ;;  %s755_s14 = smov %s614_s21 }
 0x136   : > { %s756_s15 = smov %s602_s18  ;;  %18 = sbr.rel (!%p16_p3) target bundleno = 5 (0x5), region = 77 }
 0x13d   :  { %318 = vsyncpa [#allocation3], 1 }
 0x13e   :  { %320 = vsyncpa [#allocation3 + $0x1], 1 }
 0x13f   :  { %321 = vsyncpa [#allocation4], 1 }
 0x140   :  { %323 = vsyncpa [#allocation4 + $0x1], 1 }

</bundles_post_ra>
